<compile_context>
chip_gen: v7x
topology: tpu7x:2x2x1
jax: 0.10.0
libtpu: 0.0.40
codegen_flags: <defaults>
</compile_context>

<pallas_src>
import jax
import jax.numpy as jnp
from jax.experimental import pallas as pl
from jax.experimental.pallas import tpu as pltpu


def _pfnn_fused_kernel(xT_ref, w1t_ref, b1_ref, w2t_ref, b2_ref, wot_ref,
                       bo_ref, yT_ref):
    # One grid step == one batch tile (batch on lanes); all out_d sub-networks
    # are computed at once through the packed / block-diagonal weights.
    xT = xT_ref[...]                                                   # (in_d, bt)
    h = jnp.tanh(jnp.dot(w1t_ref[...], xT,
                         preferred_element_type=jnp.float32) + b1_ref[...])  # (F, bt)
    h = jnp.tanh(jnp.dot(w2t_ref[...], h,
                         preferred_element_type=jnp.float32) + b2_ref[...])  # (F, bt)
    yT_ref[...] = (jnp.dot(wot_ref[...], h,
                           preferred_element_type=jnp.float32) + bo_ref[...])  # (out_d, bt)


def _pick_btile(B):
    # Batch sits on the lane axis, so tiles must be multiples of 128.
    # Keep >= 2 grid steps once B > 128 (software pipelining + v7x dual-TC
    # sharding via the "parallel" axis); cap at 256 to bound the (F, bt)
    # live intermediate / register pressure.
    return 128 if B <= 256 else 256


def _pack_params(params):
    """Pack per-network params into fused, transposed (features-major) operands."""
    w1, b1, w2, b2, wo, bo = params
    out_d, in_d, H = w1.shape
    F = out_d * H
    # Layer 1: (F, in_d); row (o*H + h) holds w1[o, :, h]  ->  h1^T = W1t @ x^T.
    w1t = jnp.transpose(w1, (0, 2, 1)).reshape(F, in_d)
    b1c = b1.reshape(F, 1)
    # Layer 2: block-diagonal of per-network transposed weights so each
    # network only sees its own hidden slab.
    w2t = jax.scipy.linalg.block_diag(*[w2[i].T for i in range(out_d)])   # (F, F)
    b2c = b2.reshape(F, 1)
    # Output layer: block-row layout; one matmul yields the (out_d, bt) slab.
    wot = jax.scipy.linalg.block_diag(*[wo[i].T for i in range(out_d)])   # (out_d, F)
    boc = bo.reshape(out_d, 1)
    return w1t, b1c, w2t, b2c, wot, boc


def pfnn_forward(x, params):
    B, in_d = x.shape
    out_d, _, H = params[0].shape
    F = out_d * H
    w1t, b1c, w2t, b2c, wot, boc = _pack_params(params)

    bt = _pick_btile(B)
    n_tiles = pl.cdiv(B, bt)
    B_pad = n_tiles * bt

    # Batch on lanes: pass x transposed, zero-padded to a whole number of tiles.
    xT = jnp.pad(x.T.astype(jnp.float32), ((0, 0), (0, B_pad - B)))

    yT = pl.pallas_call(
        _pfnn_fused_kernel,
        out_shape=jax.ShapeDtypeStruct((out_d, B_pad), jnp.float32),
        grid_spec=pltpu.PrefetchScalarGridSpec(
            num_scalar_prefetch=0,
            grid=(n_tiles,),
            in_specs=[
                pl.BlockSpec((in_d, bt), lambda i: (0, i)),    # x^T (batch-tiled)
                pl.BlockSpec((F, in_d), lambda i: (0, 0)),     # W1^T (resident)
                pl.BlockSpec((F, 1), lambda i: (0, 0)),        # b1
                pl.BlockSpec((F, F), lambda i: (0, 0)),        # W2^T block-diag
                pl.BlockSpec((F, 1), lambda i: (0, 0)),        # b2
                pl.BlockSpec((out_d, F), lambda i: (0, 0)),    # Wo^T block-row
                pl.BlockSpec((out_d, 1), lambda i: (0, 0)),    # bo
            ],
            out_specs=pl.BlockSpec((out_d, bt), lambda i: (0, i)),
        ),
        compiler_params=pltpu.CompilerParams(
            dimension_semantics=("parallel",)),
    )(xT, w1t, b1c, w2t, b2c, wot, boc)

    # Drop batch padding and return the (B, out_d) layout of the PyTorch module.
    return yT[:, :B].T


def pfnn_reference(x, params):
    """Pure-JAX reference of the same forward pass (per-network)."""
    w1, b1, w2, b2, wo, bo = params
    h = jnp.tanh(jnp.einsum('bi,oih->obh', x, w1) + b1)
    h = jnp.tanh(jnp.einsum('obh,ohk->obk', h, w2) + b2)
    y = jnp.einsum('obh,ohq->obq', h, wo) + bo
    return y[:, :, 0].T


def init_params(key, in_d, hidden, out_d):
    """Deterministic synthetic init: He-uniform weights, U[0,1) biases
    (matches the module's initializer='He uniform' + nn.init.uniform_ bias)."""
    ks = jax.random.split(key, 6)

    def he_uniform(k, shape, fan_in):
        bound = (6.0 / fan_in) ** 0.5
        return jax.random.uniform(k, shape, jnp.float32, -bound, bound)

    w1 = he_uniform(ks[0], (out_d, in_d, hidden), in_d)
    b1 = jax.random.uniform(ks[1], (out_d, 1, hidden), jnp.float32, 0.0, 1.0)
    w2 = he_uniform(ks[2], (out_d, hidden, hidden), hidden)
    b2 = jax.random.uniform(ks[3], (out_d, 1, hidden), jnp.float32, 0.0, 1.0)
    wo = he_uniform(ks[4], (out_d, hidden, 1), hidden)
    bo = jax.random.uniform(ks[5], (out_d, 1, 1), jnp.float32, 0.0, 1.0)
    return (w1, b1, w2, b2, wo, bo)


if __name__ == "__main__":
    B, in_d, hidden, out_d = 8, 4, 32, 3     # layers=[32, 32], out_d=3 parallel FNNs
    key = jax.random.PRNGKey(0)
    kx, kp = jax.random.split(key)
    x = jax.random.normal(kx, (B, in_d), jnp.float32)
    params = init_params(kp, in_d, hidden, out_d)

    y = jax.block_until_ready(pfnn_forward(x, params))
    y_ref = pfnn_reference(x, params)

    assert y.shape == (B, out_d), y.shape
    assert jnp.allclose(y, y_ref, atol=2e-5, rtol=1e-4), float(jnp.abs(y - y_ref).max())
    print("KERNEL_OK")
</pallas_src>

<mosaic_0001>
module attributes {stable_mosaic.version = 11 : i64} {
  func.func @_pfnn_fused_kernel(%arg0: i32, %arg1: memref<4x128xf32, #tpu.memory_space<vmem>>, %arg2: memref<96x4xf32, #tpu.memory_space<vmem>>, %arg3: memref<96x1xf32, #tpu.memory_space<vmem>>, %arg4: memref<96x96xf32, #tpu.memory_space<vmem>>, %arg5: memref<96x1xf32, #tpu.memory_space<vmem>>, %arg6: memref<3x96xf32, #tpu.memory_space<vmem>>, %arg7: memref<3x1xf32, #tpu.memory_space<vmem>>, %arg8: memref<3x128xf32, #tpu.memory_space<vmem>>) attributes {dimension_semantics = [#tpu.dimension_semantics<parallel>], iteration_bounds = array<i64: 1>, scalar_prefetch = 0 : i64, scratch_operands = 0 : i64, tpu.core_type = #tpu.core_type<tc>, window_params = [{transform_indices = @transform_0, window_bounds = array<i64: 4, 128>}, {pipeline_mode = #tpu.pipeline_mode<synchronous>, transform_indices = @transform_1, window_bounds = array<i64: 96, 4>}, {pipeline_mode = #tpu.pipeline_mode<synchronous>, transform_indices = @transform_2, window_bounds = array<i64: 96, 1>}, {pipeline_mode = #tpu.pipeline_mode<synchronous>, transform_indices = @transform_3, window_bounds = array<i64: 96, 96>}, {pipeline_mode = #tpu.pipeline_mode<synchronous>, transform_indices = @transform_4, window_bounds = array<i64: 96, 1>}, {pipeline_mode = #tpu.pipeline_mode<synchronous>, transform_indices = @transform_5, window_bounds = array<i64: 3, 96>}, {pipeline_mode = #tpu.pipeline_mode<synchronous>, transform_indices = @transform_6, window_bounds = array<i64: 3, 1>}, {transform_indices = @transform_7, window_bounds = array<i64: 3, 128>}]} {
    %c0 = arith.constant 0 : index
    %c0_0 = arith.constant 0 : index
    %0 = vector.load %arg1[%c0, %c0_0] : memref<4x128xf32, #tpu.memory_space<vmem>>, vector<4x128xf32>
    %c0_1 = arith.constant 0 : index
    %c0_2 = arith.constant 0 : index
    %1 = vector.load %arg2[%c0_1, %c0_2] : memref<96x4xf32, #tpu.memory_space<vmem>>, vector<96x4xf32>
    %cst = arith.constant dense<0.000000e+00> : vector<96x128xf32>
    %2 = tpu.matmul %1, %0, %cst {dimension_numbers = #tpu.dot_dimension_numbers<[1], [0], [0], [1], [0, 0, 1, 1], [], []>} : vector<96x4xf32>, vector<4x128xf32>, vector<96x128xf32> -> vector<96x128xf32>
    %c0_3 = arith.constant 0 : index
    %c0_4 = arith.constant 0 : index
    %3 = vector.load %arg3[%c0_3, %c0_4] : memref<96x1xf32, #tpu.memory_space<vmem>>, vector<96x1xf32>
    %4 = vector.broadcast %3 : vector<96x1xf32> to vector<96x128xf32>
    %5 = arith.addf %2, %4 : vector<96x128xf32>
    %6 = math.tanh %5 : vector<96x128xf32>
    %c0_5 = arith.constant 0 : index
    %c0_6 = arith.constant 0 : index
    %7 = vector.load %arg4[%c0_5, %c0_6] : memref<96x96xf32, #tpu.memory_space<vmem>>, vector<96x96xf32>
    %cst_7 = arith.constant dense<0.000000e+00> : vector<96x128xf32>
    %8 = tpu.matmul %7, %6, %cst_7 {dimension_numbers = #tpu.dot_dimension_numbers<[1], [0], [0], [1], [0, 0, 1, 1], [], []>} : vector<96x96xf32>, vector<96x128xf32>, vector<96x128xf32> -> vector<96x128xf32>
    %c0_8 = arith.constant 0 : index
    %c0_9 = arith.constant 0 : index
    %9 = vector.load %arg5[%c0_8, %c0_9] : memref<96x1xf32, #tpu.memory_space<vmem>>, vector<96x1xf32>
    %10 = vector.broadcast %9 : vector<96x1xf32> to vector<96x128xf32>
    %11 = arith.addf %8, %10 : vector<96x128xf32>
    %12 = math.tanh %11 : vector<96x128xf32>
    %c0_10 = arith.constant 0 : index
    %c0_11 = arith.constant 0 : index
    %13 = vector.load %arg6[%c0_10, %c0_11] : memref<3x96xf32, #tpu.memory_space<vmem>>, vector<3x96xf32>
    %cst_12 = arith.constant dense<0.000000e+00> : vector<3x128xf32>
    %14 = tpu.matmul %13, %12, %cst_12 {dimension_numbers = #tpu.dot_dimension_numbers<[1], [0], [0], [1], [0, 0, 1, 1], [], []>} : vector<3x96xf32>, vector<96x128xf32>, vector<3x128xf32> -> vector<3x128xf32>
    %c0_13 = arith.constant 0 : index
    %c0_14 = arith.constant 0 : index
    %15 = vector.load %arg7[%c0_13, %c0_14] : memref<3x1xf32, #tpu.memory_space<vmem>>, vector<3x1xf32>
    %16 = vector.broadcast %15 : vector<3x1xf32> to vector<3x128xf32>
    %17 = arith.addf %14, %16 : vector<3x128xf32>
    %c0_15 = arith.constant 0 : index
    %c0_16 = arith.constant 0 : index
    %18 = vector.load %arg8[%c0_15, %c0_16] : memref<3x128xf32, #tpu.memory_space<vmem>>, vector<3x128xf32>
    tpu.vector_store %arg8[%c0_15, %c0_16], %17 {strides = array<i32>} : memref<3x128xf32, #tpu.memory_space<vmem>>, vector<3x128xf32>,
    return
  }
  func.func @transform_0(%arg0: i32) -> (i32, i32) {
    %c0_i32 = arith.constant 0 : i32
    %c0_i32_0 = arith.constant 0 : i32
    return %c0_i32, %arg0 : i32, i32
  }
  func.func @transform_1(%arg0: i32) -> (i32, i32) {
    %c0_i32 = arith.constant 0 : i32
    %c0_i32_0 = arith.constant 0 : i32
    %c0_i32_1 = arith.constant 0 : i32
    return %c0_i32, %c0_i32_0 : i32, i32
  }
  func.func @transform_2(%arg0: i32) -> (i32, i32) {
    %c0_i32 = arith.constant 0 : i32
    %c0_i32_0 = arith.constant 0 : i32
    %c0_i32_1 = arith.constant 0 : i32
    return %c0_i32, %c0_i32_0 : i32, i32
  }
  func.func @transform_3(%arg0: i32) -> (i32, i32) {
    %c0_i32 = arith.constant 0 : i32
    %c0_i32_0 = arith.constant 0 : i32
    %c0_i32_1 = arith.constant 0 : i32
    return %c0_i32, %c0_i32_0 : i32, i32
  }
  func.func @transform_4(%arg0: i32) -> (i32, i32) {
    %c0_i32 = arith.constant 0 : i32
    %c0_i32_0 = arith.constant 0 : i32
    %c0_i32_1 = arith.constant 0 : i32
    return %c0_i32, %c0_i32_0 : i32, i32
  }
  func.func @transform_5(%arg0: i32) -> (i32, i32) {
    %c0_i32 = arith.constant 0 : i32
    %c0_i32_0 = arith.constant 0 : i32
    %c0_i32_1 = arith.constant 0 : i32
    return %c0_i32, %c0_i32_0 : i32, i32
  }
  func.func @transform_6(%arg0: i32) -> (i32, i32) {
    %c0_i32 = arith.constant 0 : i32
    %c0_i32_0 = arith.constant 0 : i32
    %c0_i32_1 = arith.constant 0 : i32
    return %c0_i32, %c0_i32_0 : i32, i32
  }
  func.func @transform_7(%arg0: i32) -> (i32, i32) {
    %c0_i32 = arith.constant 0 : i32
    %c0_i32_0 = arith.constant 0 : i32
    return %c0_i32, %arg0 : i32, i32
  }
}

</mosaic_0001>

<bundles_post_ra>
// kernel: tpu_custom_call.1
= control target key start
LH: loop header
LB: loop body
LE: loop exit
PB: predicated region body
PF: predicated region fallthrough
CT: control target
= control target key end

     0   :  { %vm149_vm0 = vcmask 1043456   ;;  %vm112_vm1 = vcmask 31744   ;;  %v929_v4 = vmov 0   ;;  %s1170_s0 = inlined_call_operand.vmem [shape: f32[4,128], index: 0, kind: input, shape index: {}]   ;;  %s1171_s1 = inlined_call_operand.vmem [shape: f32[96,4], index: 1, kind: input, shape index: {}]   ;;  %s1172_s2 = inlined_call_operand.vmem [shape: f32[96,1], index: 2, kind: input, shape index: {}]   ;;  %s1173_s3 = inlined_call_operand.vmem [shape: f32[96,96], index: 3, kind: input, shape index: {}]   ;;  %s1174_s4 = inlined_call_operand.vmem [shape: f32[96,1], index: 4, kind: input, shape index: {}]   ;;  %s1175_s5 = inlined_call_operand.vmem [shape: f32[3,96], index: 5, kind: input, shape index: {}]   ;;  %s1176_s6 = inlined_call_operand.vmem [shape: f32[3,1], index: 6, kind: input, shape index: {}]   ;;  %s1177_s7 = inlined_call_operand.hbm [shape: f32[3,128], index: 7, kind: output, shape index: {}]  }
   0x1   :  { %v27_v0 = vld [vmem:[%s1170_s0] sm:$0xf]  ;;  %v29_v2 = vld [vmem:[%s1171_s1 + $0x8] sm:$0xff]  ;;  %v30_v3 = vld [vmem:[%s1171_s1 + $0x10] sm:$0xff]  ;;  %855 = vset.pattern.permute.xlu0 %v929_v4  ;;  %856 = vset.pattern.permute.xlu1 %v929_v4 }
   0x2   :  { %v28_v1 = vld [vmem:[%s1171_s1] sm:$0xff]  ;;  %719 = vmatprep.subr.msk.mxu0 %vm149_vm0, %v27_v0  ;;  %v31_v5 = vld [vmem:[%s1171_s1 + $0x18] sm:$0xff]  ;;  %v42_v8 = vld [vmem:[%s1172_s2 + $0x10] sm:$0xff] }
   0x3   :  { %721 = vmatprep.mubr.msk.f32.mxu0 %vm112_vm1, %v28_v1  ;;  %720 = vmatpush3.msk.msra.mxu0 %vm149_vm0, %v27_v0  ;;  %v40_v6 = vld [vmem:[%s1172_s2] sm:$0xff]  ;;  %v41_v9 = vld [vmem:[%s1172_s2 + $0x8] sm:$0xff]  ;;  %v43_v10 = vld [vmem:[%s1172_s2 + $0x18] sm:$0xff] }
   0x4   :  { %722 = vmatmul.mubr.msk.f32.vlgmr.msra.gmra.mrb[0].mxu0 %vm112_vm1, %v29_v2  ;;  %v32_v7 = vld [vmem:[%s1171_s1 + $0x20] sm:$0xff]  ;;  %54 = vperm.xlu0 %855, %v40_v6   ;;  %v33_v11 = vld [vmem:[%s1171_s1 + $0x28] sm:$0xff]  ;;  %v34_v12 = vld [vmem:[%s1171_s1 + $0x30] sm:$0xff] }
   0x5   :  { %724 = vmatprep.mubr.msk.f32.mxu0 %vm112_vm1, %v30_v3  ;;  %64 = vperm.xlu1 %856, %v42_v8   ;;  %v44_v13 = vld [vmem:[%s1172_s2 + $0x20] sm:$0xff]  ;;  %v45_v14 = vld [vmem:[%s1172_s2 + $0x28] sm:$0xff]  ;;  %v35_v15 = vld [vmem:[%s1171_s1 + $0x38] sm:$0xff] }
   0x8   :  { %725 = vmatmul.mubr.msk.f32.gmra.mrb[2].mxu0 %vm112_vm1, %v31_v5  ;;  %59 = vperm.xlu0 %855, %v41_v9  }
   0x9   :  { %727 = vmatprep.mubr.msk.f32.mxu0 %vm112_vm1, %v32_v7  ;;  %69 = vperm.xlu1 %856, %v43_v10  }
   0xc   :  { %728 = vmatmul.mubr.msk.f32.gmra.mrb[4].mxu0 %vm112_vm1, %v33_v11 }
   0xd   :  { %730 = vmatprep.mubr.msk.f32.mxu0 %vm112_vm1, %v34_v12 }
   0xe   :  { %12 = vsyncpa [#allocation3], 0  ;;  %v36_v16 = vld [vmem:[%s1171_s1 + $0x40] sm:$0xff]  ;;  %74 = vperm.xlu0 %855, %v44_v13   ;;  %v46_v17 = vld [vmem:[%s1172_s2 + $0x30] sm:$0xff]  ;;  %79 = vperm.xlu1 %856, %v45_v14   ;;  %vm374_vm2 = vcmask 785408   ;;  %vm931_vm3 = vmmov 0  }
   0xf   :  { %v47_v18 = vld [vmem:[%s1172_s2 + $0x38] sm:$0xff]  ;;  %v37_v19 = vld [vmem:[%s1171_s1 + $0x48] sm:$0xff]  ;;  %v38_v20 = vld [vmem:[%s1171_s1 + $0x50] sm:$0xff]  ;;  %s933_s23 = smov [#allocation2]  }
  0x10   :  { %731 = vmatmul.mubr.msk.f32.gmra.mrb[6].mxu0 %vm112_vm1, %v35_v15  ;;  %v48_v21 = vld [vmem:[%s1172_s2 + $0x40] sm:$0xff]  ;;  %v49_v22 = vld [vmem:[%s1172_s2 + $0x48] sm:$0xff]  ;;  %v39_v23 = vld [vmem:[%s1171_s1 + $0x58] sm:$0xff]  ;;  %s635_s24 = sshll.u32 %s933_s23, 4  ;;  %s636_s24 = int_to_ptr.vmem [resolvable:$true] %s635_s24 }
  0x11   :  { %733 = vmatprep.mubr.msk.f32.mxu0 %vm112_vm1, %v36_v16  ;;  %v50_v24 = vld [vmem:[%s1172_s2 + $0x50] sm:$0xff]  ;;  %v51_v25 = vld [vmem:[%s1172_s2 + $0x58] sm:$0xff]  ;;  %v302_v26 = vld [vmem:[%s1174_s4] sm:$0xff]  ;;  %s905_s25 = scalar_lea.vmem %s636_s24, 64  ;;  %p910_p1 = scmp.lt.s32.totalorder %s636_s24, %s636_s24 }
  0x12   :  { %84 = vperm.xlu0 %855, %v46_v17   ;;  %89 = vperm.xlu1 %856, %v47_v18   ;;  %v303_v27 = vld [vmem:[%s1174_s4 + $0x8] sm:$0xff]  ;;  %v304_v28 = vld [vmem:[%s1174_s4 + $0x10] sm:$0xff]  ;;  %v305_v29 = vld [vmem:[%s1174_s4 + $0x18] sm:$0xff]  ;;  %p906_p0 = scmp.ne.s32.totalorder %s636_s24, %s905_s25  ;;  %p911_p2 = scmp.lt.s32.totalorder %s905_s25, %s905_s25 }
  0x13   :  { %v306_v30 = vld [vmem:[%s1174_s4 + $0x20] sm:$0xff]  ;;  %v307_v31 = vld [vmem:[%s1174_s4 + $0x28] sm:$0xff]  ;;  %v308_v32 = vld [vmem:[%s1174_s4 + $0x30] sm:$0xff] }
  0x14   :  { %734 = vmatmul.mubr.msk.f32.gmra.mrb[8].mxu0 %vm112_vm1, %v37_v19  ;;  %v309_v33 = vld [vmem:[%s1174_s4 + $0x38] sm:$0xff]  ;;  %v310_v34 = vld [vmem:[%s1174_s4 + $0x40] sm:$0xff]  ;;  %v311_v35 = vld [vmem:[%s1174_s4 + $0x48] sm:$0xff]  ;;  %p912_p3 = por %p911_p2, %p910_p1 }
  0x15   :  { %736 = vmatprep.mubr.msk.f32.mxu0 %vm112_vm1, %v38_v20  ;;  %v312_v36 = vld [vmem:[%s1174_s4 + $0x50] sm:$0xff]  ;;  %v313_v37 = vld [vmem:[%s1174_s4 + $0x58] sm:$0xff]  ;;  %v549_v38 = vld [vmem:[%s1176_s6] sm:$0x7] }
  0x16   :  { %94 = vperm.xlu0 %855, %v48_v21   ;;  %99 = vperm.xlu1 %856, %v49_v22   ;;  %v290_v39 = vld [vmem:[%s1173_s3] sm:$0xff]  ;;  %p913_p4 = pnand %p912_p3, %p906_p0 }
  0x17   :  { %763 = vmatprep.mubr.msk.f32.mxu1 %vm374_vm2, %v290_v39  ;;  %v300_v39 = vld [vmem:[%s1173_s3 + $0x50] sm:$0xff] }
  0x18   :  { %737 = vmatmul.mubr.msk.f32.gmra.mrb[10].mxu0 %vm112_vm1, %v39_v23 }
  0x1a   :  { %104 = vperm.xlu0 %855, %v50_v24   ;;  %109 = vperm.xlu1 %856, %v51_v25  }
  0x1e   :  { %316 = vperm.xlu0 %855, %v302_v26   ;;  %321 = vperm.xlu1 %856, %v303_v27  }
  0x22   :  { %326 = vperm.xlu0 %855, %v304_v28   ;;  %331 = vperm.xlu1 %856, %v305_v29  }
  0x26   :  { %336 = vperm.xlu0 %855, %v306_v30   ;;  %341 = vperm.xlu1 %856, %v307_v31   ;;  %v291_v30 = vld [vmem:[%s1173_s3 + $0x8] sm:$0xff]  ;;  %v292_v31 = vld [vmem:[%s1173_s3 + $0x10] sm:$0xff] }
  0x2a   :  { %346 = vperm.xlu0 %855, %v308_v32   ;;  %351 = vperm.xlu1 %856, %v309_v33   ;;  %v293_v32 = vld [vmem:[%s1173_s3 + $0x18] sm:$0xff]  ;;  %v294_v33 = vld [vmem:[%s1173_s3 + $0x20] sm:$0xff] }
  0x2e   :  { %356 = vperm.xlu0 %855, %v310_v34   ;;  %361 = vperm.xlu1 %856, %v311_v35   ;;  %v295_v34 = vld [vmem:[%s1173_s3 + $0x28] sm:$0xff]  ;;  %v296_v35 = vld [vmem:[%s1173_s3 + $0x30] sm:$0xff] }
  0x32   :  { %366 = vperm.xlu0 %855, %v312_v36   ;;  %371 = vperm.xlu1 %856, %v313_v37   ;;  %v297_v36 = vld [vmem:[%s1173_s3 + $0x38] sm:$0xff]  ;;  %v298_v37 = vld [vmem:[%s1173_s3 + $0x40] sm:$0xff] }
  0x36   :  { %552 = vperm.xlu0 %855, %v549_v38   ;;  %v299_v38 = vld [vmem:[%s1173_s3 + $0x48] sm:$0xff] }
  0x83   :  { %v55_v41 = vpop.permute.xlu0 %54 }
  0x84   :  { %v65_v40 = vpop.permute.xlu1 %64 }
  0x87   :  { %v60_v43 = vpop.permute.xlu0 %59 }
  0x88   :  { %v70_v42 = vpop.permute.xlu1 %69 }
  0x8d   :  { %v80_v47 = vpop.permute.xlu1 %79  ;;  %v75_v49 = vpop.permute.xlu0 %74 }
  0x91   :  { %v90_v54 = vpop.permute.xlu1 %89  ;;  %v85_v56 = vpop.permute.xlu0 %84 }
  0x95   :  { %v100_v1 = vpop.permute.xlu1 %99  ;;  %v95_v3 = vpop.permute.xlu0 %94 }
  0x99   :  { %v110_v12 = vpop.permute.xlu1 %109  ;;  %v105_v15 = vpop.permute.xlu0 %104 }
  0xd7   :  { %v723_v44 = vpop.f32.mrb[0].mxu0 }
  0xd8   :  { %v225_v45 = vadd.f32 %v723_v44, %v60_v43  ;;  %v219_v46 = vpop.f32.mrb[1].mxu0  ;;  %v322_v43 = vpop.permute.xlu1 %321 }
  0xd9   :  { %v220_v48 = vadd.f32 %v219_v46, %v55_v41  ;;  %v930_v41 = vmov 0.0|0.0   ;;  %v317_v44 = vpop.permute.xlu0 %316 }
  0xda   :  { %857 = vtanh.f32 %v225_v45  ;;  %832 = vmatprep.subr.bf16.mxu0 %v930_v41 }
  0xdb   :  { %859 = vtanh.f32 %v220_v48  ;;  %v726_v50 = vpop.f32.mrb[2].mxu0 }
  0xdc   :  { %v235_v51 = vadd.f32 %v726_v50, %v70_v42  ;;  %v229_v52 = vpop.f32.mrb[3].mxu0  ;;  %v932_v42 = vmov 0.0   ;;  %v332_v45 = vpop.permute.xlu1 %331 }
  0xdd   :  { %v230_v53 = vadd.f32 %v229_v52, %v65_v40  ;;  %v301_v40 = vld [vmem:[%s1173_s3 + $0x58] sm:$0xff]  ;;  %805 = vmatprep.mubr.msk.f32.mxu0 %vm931_vm3, %v932_v42  ;;  %v327_v46 = vpop.permute.xlu0 %326 }
  0xde   :  { %861 = vtanh.f32 %v235_v51 }
  0xdf   :  { %863 = vtanh.f32 %v230_v53  ;;  %v729_v55 = vpop.f32.mrb[4].mxu0 }
  0xe0   :  { %v245_v57 = vadd.f32 %v729_v55, %v80_v47  ;;  %v239_v58 = vpop.f32.mrb[5].mxu0  ;;  %v342_v50 = vpop.permute.xlu1 %341 }
  0xe1   :  { %v240_v59 = vadd.f32 %v239_v58, %v75_v49  ;;  %v337_v52 = vpop.permute.xlu0 %336 }
  0xe2   :  { %865 = vtanh.f32 %v245_v57 }
  0xe3   :  { %867 = vtanh.f32 %v240_v59  ;;  %v732_v60 = vpop.f32.mrb[6].mxu0 }
  0xe4   :  { %v858_v61 = vpop.eup %857  ;;  %v255_v62 = vadd.f32 %v732_v60, %v90_v54  ;;  %v249_v63 = vpop.f32.mrb[7].mxu0 }
  0xe5   :  { %v860_v0 = vpop.eup %859  ;;  %v250_v2 = vadd.f32 %v249_v63, %v85_v56  ;;  %v352_v57 = vpop.permute.xlu1 %351 }
  0xe6   :  { %869 = vtanh.f32 %v255_v62  ;;  %v808_v4 = vpack.c.bf16 %v858_v61, %v860_v0  ;;  %v347_v59 = vpop.permute.xlu0 %346 }
  0xe7   :  { %871 = vtanh.f32 %v250_v2  ;;  %v735_v5 = vpop.f32.mrb[8].mxu0 }
  0xe8   :  { %v862_v6 = vpop.eup %861  ;;  %v265_v7 = vadd.f32 %v735_v5, %v100_v1  ;;  %v259_v8 = vpop.f32.mrb[9].mxu0  ;;  %809 = vmatprep.subr.bf16.mxu1 %v808_v4 }
  0xe9   :  { %v864_v9 = vpop.eup %863  ;;  %v260_v10 = vadd.f32 %v259_v8, %v95_v3  ;;  %811 = vmatpush3.bf16.msra.mxu1 %v808_v4  ;;  %v362_v4 = vpop.permute.xlu1 %361 }
  0xea   :  { %873 = vtanh.f32 %v265_v7  ;;  %v812_v11 = vpack.c.bf16 %v862_v6, %v864_v9  ;;  %v357_v6 = vpop.permute.xlu0 %356 }
  0xeb   :  { %875 = vtanh.f32 %v260_v10  ;;  %v738_v13 = vpop.f32.mrb[10].mxu0 }
  0xec   :  { %v866_v14 = vpop.eup %865  ;;  %v275_v16 = vadd.f32 %v738_v13, %v110_v12  ;;  %v269_v17 = vpop.f32.mrb[11].mxu0  ;;  %813 = vmatprep.subr.bf16.mxu1 %v812_v11 }
  0xed   :  { %v868_v18 = vpop.eup %867  ;;  %v270_v19 = vadd.f32 %v269_v17, %v105_v15  ;;  %815 = vmatpush3.bf16.msra.mxu1 %v812_v11  ;;  %v372_v15 = vpop.permute.xlu1 %371 }
  0xee   :  { %877 = vtanh.f32 %v275_v16  ;;  %v816_v20 = vpack.c.bf16 %v866_v14, %v868_v18  ;;  %v367_v18 = vpop.permute.xlu0 %366 }
  0xef   :  { %879 = vtanh.f32 %v270_v19 }
  0xf0   :  { %v870_v21 = vpop.eup %869  ;;  %817 = vmatprep.subr.bf16.mxu1 %v816_v20 }
  0xf1   :  { %v872_v22 = vpop.eup %871  ;;  %819 = vmatpush3.bf16.msra.mxu1 %v816_v20 }
  0xf2   :  { %v820_v23 = vpack.c.bf16 %v870_v21, %v872_v22 }
  0xf4   :  { %v874_v24 = vpop.eup %873  ;;  %821 = vmatprep.subr.bf16.mxu1 %v820_v23 }
  0xf5   :  { %v876_v25 = vpop.eup %875  ;;  %823 = vmatpush3.bf16.msra.mxu1 %v820_v23 }
  0xf6   :  { %v824_v26 = vpack.c.bf16 %v874_v24, %v876_v25 }
  0xf8   :  { %v878_v27 = vpop.eup %877  ;;  %825 = vmatprep.subr.bf16.mxu1 %v824_v26 }
  0xf9   :  { %v880_v28 = vpop.eup %879  ;;  %827 = vmatpush3.bf16.msra.mxu1 %v824_v26 }
  0xfa   :  { %v828_v29 = vpack.c.bf16 %v878_v27, %v880_v28 }
  0xfc   :  { %829 = vmatprep.subr.bf16.mxu1 %v828_v29 }
  0xfd   :  { %831 = vmatpush3.bf16.msra.mxu1 %v828_v29 }
 0x100   :  { %764 = vmatmul.mubr.msk.f32.vlgmr.msra.gmra.mrb[0].mxu1 %vm374_vm2, %v291_v30 }
 0x101   :  { %766 = vmatprep.mubr.msk.f32.mxu1 %vm374_vm2, %v292_v31 }
 0x104   :  { %767 = vmatmul.mubr.msk.f32.gmra.mrb[2].mxu1 %vm374_vm2, %v293_v32 }
 0x105   :  { %769 = vmatprep.mubr.msk.f32.mxu1 %vm374_vm2, %v294_v33  ;;  %v548_v33 = vld [vmem:[%s1175_s5] sm:$0x7] }
 0x108   :  { %770 = vmatmul.mubr.msk.f32.gmra.mrb[4].mxu1 %vm374_vm2, %v295_v34  ;;  %v553_v34 = vpop.permute.xlu0 %552 }
 0x109   :  { %772 = vmatprep.mubr.msk.f32.mxu1 %vm374_vm2, %v296_v35 }
 0x10c   :  { %773 = vmatmul.mubr.msk.f32.gmra.mrb[6].mxu1 %vm374_vm2, %v297_v36 }
 0x10d   :  { %775 = vmatprep.mubr.msk.f32.mxu1 %vm374_vm2, %v298_v37 }
 0x110   :  { %776 = vmatmul.mubr.msk.f32.gmra.mrb[8].mxu1 %vm374_vm2, %v299_v38 }
 0x111   :  { %778 = vmatprep.mubr.msk.f32.mxu1 %vm374_vm2, %v300_v39 }
 0x114   :  { %779 = vmatmul.mubr.msk.f32.gmra.mrb[10].mxu1 %vm374_vm2, %v301_v40 }
 0x1d3   :  { %v765_v47 = vpop.f32.mrb[0].mxu1 }
 0x1d4   :  { %v483_v48 = vadd.f32 %v765_v47, %v322_v43  ;;  %v477_v49 = vpop.f32.mrb[1].mxu1 }
 0x1d5   :  { %v478_v51 = vadd.f32 %v477_v49, %v317_v44 }
 0x1d6   :  { %881 = vtanh.f32 %v483_v48 }
 0x1d7   :  { %883 = vtanh.f32 %v478_v51  ;;  %v768_v53 = vpop.f32.mrb[2].mxu1 }
 0x1d8   :  { %v493_v54 = vadd.f32 %v768_v53, %v332_v45  ;;  %v487_v55 = vpop.f32.mrb[3].mxu1 }
 0x1d9   :  { %v488_v56 = vadd.f32 %v487_v55, %v327_v46 }
 0x1da   :  { %885 = vtanh.f32 %v493_v54 }
 0x1db   :  { %887 = vtanh.f32 %v488_v56  ;;  %v771_v58 = vpop.f32.mrb[4].mxu1 }
 0x1dc   :  { %v503_v60 = vadd.f32 %v771_v58, %v342_v50  ;;  %v497_v61 = vpop.f32.mrb[5].mxu1 }
 0x1dd   :  { %v498_v62 = vadd.f32 %v497_v61, %v337_v52 }
 0x1de   :  { %889 = vtanh.f32 %v503_v60 }
 0x1df   :  { %891 = vtanh.f32 %v498_v62  ;;  %v774_v63 = vpop.f32.mrb[6].mxu1 }
 0x1e0   :  { %v882_v0 = vpop.eup %881  ;;  %v513_v1 = vadd.f32 %v774_v63, %v352_v57  ;;  %v507_v2 = vpop.f32.mrb[7].mxu1 }
 0x1e1   :  { %v884_v3 = vpop.eup %883  ;;  %v508_v5 = vadd.f32 %v507_v2, %v347_v59 }
 0x1e2   :  { %893 = vtanh.f32 %v513_v1  ;;  %v833_v7 = vpack.c.bf16 %v882_v0, %v884_v3 }
 0x1e3   :  { %895 = vtanh.f32 %v508_v5  ;;  %v777_v8 = vpop.f32.mrb[8].mxu1 }
 0x1e4   :  { %v886_v9 = vpop.eup %885  ;;  %v523_v10 = vadd.f32 %v777_v8, %v362_v4  ;;  %v517_v11 = vpop.f32.mrb[9].mxu1  ;;  %834 = vmatpush3.bf16.msra.mxu0 %v833_v7 }
 0x1e5   :  { %v888_v12 = vpop.eup %887  ;;  %v518_v13 = vadd.f32 %v517_v11, %v357_v6  ;;  %835 = vmatprep.subr.bf16.mxu0 %v930_v41 }
 0x1e6   :  { %897 = vtanh.f32 %v523_v10  ;;  %v836_v14 = vpack.c.bf16 %v886_v9, %v888_v12 }
 0x1e7   :  { %899 = vtanh.f32 %v518_v13  ;;  %v780_v16 = vpop.f32.mrb[10].mxu1 }
 0x1e8   :  { %v890_v17 = vpop.eup %889  ;;  %v533_v19 = vadd.f32 %v780_v16, %v372_v15  ;;  %v527_v20 = vpop.f32.mrb[11].mxu1  ;;  %837 = vmatpush3.bf16.msra.mxu0 %v836_v14 }
 0x1e9   :  { %v892_v21 = vpop.eup %891  ;;  %v528_v22 = vadd.f32 %v527_v20, %v367_v18  ;;  %838 = vmatprep.subr.bf16.mxu0 %v930_v41 }
 0x1ea   :  { %901 = vtanh.f32 %v533_v19  ;;  %v839_v23 = vpack.c.bf16 %v890_v17, %v892_v21 }
 0x1eb   :  { %903 = vtanh.f32 %v528_v22 }
 0x1ec   :  { %v894_v24 = vpop.eup %893  ;;  %840 = vmatpush3.bf16.msra.mxu0 %v839_v23 }
 0x1ed   :  { %v896_v25 = vpop.eup %895  ;;  %841 = vmatprep.subr.bf16.mxu0 %v930_v41 }
 0x1ee   :  { %v842_v26 = vpack.c.bf16 %v894_v24, %v896_v25 }
 0x1f0   :  { %v898_v27 = vpop.eup %897  ;;  %843 = vmatpush3.bf16.msra.mxu0 %v842_v26 }
 0x1f1   :  { %v900_v28 = vpop.eup %899  ;;  %844 = vmatprep.subr.bf16.mxu0 %v930_v41 }
 0x1f2   :  { %v845_v29 = vpack.c.bf16 %v898_v27, %v900_v28 }
 0x1f4   :  { %v902_v30 = vpop.eup %901  ;;  %846 = vmatpush3.bf16.msra.mxu0 %v845_v29 }
 0x1f5   :  { %v904_v31 = vpop.eup %903  ;;  %847 = vmatprep.subr.bf16.mxu0 %v930_v41 }
 0x1f6   :  { %v848_v32 = vpack.c.bf16 %v902_v30, %v904_v31 }
 0x1f8   :  { %849 = vmatpush3.bf16.msra.mxu0 %v848_v32 }
 0x1fb   :  { %806 = vmatmul.mubr.msk.f32.vlgmr.msra.gmra.mrb[12].mxu0 %vm374_vm2, %v548_v33 }
 0x2ce   :  { %v624_v35 = vpop.f32.mrb[12].mxu0 }
 0x2cf   :  { %v625_v36 = vadd.f32 %v624_v35, %v553_v34  ;;  %v807_v37 = vpop.f32.mrb[13].mxu0 }
 0x2d1   :  { %628 = vst [vmem:[#allocation2] sm:$0x7] %v625_v36 }
 0x2d2   :  { %916 = shalt.err (!%p913_p4)
}
 0x2d3   :  { %s917_s5 = scalar_lea.hbm %s1177_s7, 64 }
 0x2d4   :  { %p918_p5 = scmp.ne.s32.totalorder %s1177_s7, %s917_s5  ;;  %p921_p6 = scmp.lt.u32.totalorder %s917_s5, %s1177_s7 }
 0x2d6   :  { %p923_p7 = pnand %p921_p6, %p918_p5 }
 0x2d8   :  { %926 = shalt.err (!%p923_p7)
}
 0x2d9   :  { %638 = dma.vmem_to_hbm [thread:$0]  %s636_s24, 64, %s1177_s7, [#allocation3]  }
 0x2da   :  { %927 = dma.done.wait [#allocation3], 64  }
 0x2db   :  { %928 = vsyncadd [#allocation3], 4294967232 }
 0x2dc   :  { %642 = vsyncpa [#allocation3], 1 }

</bundles_post_ra>
